<compile_context>
chip_gen: v7x
topology: tpu7x:2x2x1
jax: 0.10.0
libtpu: 0.0.40
codegen_flags: <defaults>
</compile_context>

<pallas_src>
import functools

import numpy as np
import jax
import jax.numpy as jnp
from jax.experimental import pallas as pl
from jax.experimental.pallas import tpu as pltpu

BN_EPS = 1e-5
_ROW = 16                       # row-tile granularity (bf16 sublane packing friendly)
_MM_TM = 256                    # target M tile for matmul-style kernels
_EW_TM = 512                    # target M tile for elementwise kernels
_NEG_LARGE = float(jnp.finfo(jnp.bfloat16).min)


# ----------------------------------------------------------------------------
# helpers
# ----------------------------------------------------------------------------
def _round_up(x, m):
    return ((x + m - 1) // m) * m


def _choose_tm(m, target):
    target = _round_up(target, _ROW)
    mp = _round_up(max(m, _ROW), _ROW)
    if mp >= target:
        return target, _round_up(m, target)
    return mp, mp


def _pad_rows(a2d, rows):
    if a2d.shape[0] == rows:
        return a2d
    return jnp.pad(a2d, ((0, rows - a2d.shape[0]), (0, 0)))


# ----------------------------------------------------------------------------
# Kernel 1: fused (BN+ReLU prologue) -> matmul + bias -> (+skip epilogues)
# Used for 1x1 convs, the stride-2 stem conv (im2col, tiny) and the FC heads.
# ----------------------------------------------------------------------------
def _make_mm_kernel(has_bn, n_skip):
    def kernel(*refs):
        idx = 0
        x = refs[idx][...]
        idx += 1
        if has_bn:
            scale = refs[idx][...]
            shift = refs[idx + 1][...]
            idx += 2
            x = jnp.maximum(x.astype(jnp.float32) * scale + shift, 0.0)
        a = x.astype(jnp.bfloat16)
        w_ref, b_ref = refs[idx], refs[idx + 1]
        idx += 2
        acc = jnp.dot(a, w_ref[...], preferred_element_type=jnp.float32) + b_ref[...]
        for s in range(n_skip):
            acc = acc + refs[idx + s][...].astype(jnp.float32)
        refs[-1][...] = acc.astype(refs[-1].dtype)

    return kernel


@functools.lru_cache(maxsize=None)
def _build_mm_call(mp, kp, n, tm, has_bn, n_skip, out_dtype):
    in_specs = [pl.BlockSpec((tm, kp), lambda i: (i, 0))]
    if has_bn:
        in_specs += [pl.BlockSpec((1, kp), lambda i: (0, 0)),
                     pl.BlockSpec((1, kp), lambda i: (0, 0))]
    in_specs += [pl.BlockSpec((kp, n), lambda i: (0, 0)),
                 pl.BlockSpec((1, n), lambda i: (0, 0))]
    in_specs += [pl.BlockSpec((tm, n), lambda i: (i, 0)) for _ in range(n_skip)]
    call = pl.pallas_call(
        _make_mm_kernel(has_bn, n_skip),
        out_shape=jax.ShapeDtypeStruct((mp, n), out_dtype),
        grid=(mp // tm,),
        in_specs=in_specs,
        out_specs=pl.BlockSpec((tm, n), lambda i: (i, 0)),
        compiler_params=pltpu.CompilerParams(dimension_semantics=("parallel",)),
    )
    return jax.jit(call)


def fused_matmul(x2d, w, b, scale=None, shift=None, skips=(), out_dtype=jnp.bfloat16):
    m, k = x2d.shape
    n = w.shape[1]
    kp = _round_up(max(k, _ROW), _ROW)
    if kp != k:                      # pad tiny contraction dims (Cout=1 heads, stem im2col)
        x2d = jnp.pad(x2d, ((0, 0), (0, kp - k)))
        w = jnp.pad(w, ((0, kp - k), (0, 0)))
        if scale is not None:
            scale = jnp.pad(scale, (0, kp - k))
            shift = jnp.pad(shift, (0, kp - k))
    tm, mp = _choose_tm(m, _MM_TM)
    args = [_pad_rows(x2d.astype(jnp.bfloat16), mp)]
    if scale is not None:
        args += [scale.reshape(1, kp).astype(jnp.float32),
                 shift.reshape(1, kp).astype(jnp.float32)]
    args += [w.astype(jnp.bfloat16), b.reshape(1, n).astype(jnp.float32)]
    args += [_pad_rows(s.astype(jnp.bfloat16), mp) for s in skips]
    call = _build_mm_call(mp, kp, n, tm, scale is not None, len(skips), out_dtype)
    return call(*args)[:m]


# ----------------------------------------------------------------------------
# Kernel 2: fused BN+ReLU + 3x3 stride-1 pad-1 convolution (no im2col).
# The zero-padded image is row-flattened; each grid step reads its (tm) rows plus a
# small halo block of the following rows and accumulates the 9 shifted-window matmuls.
# Outputs are computed on the padded grid and the border is sliced off afterwards.
# ----------------------------------------------------------------------------
def _make_conv3_kernel(tm, wp, cin, cout):
    offsets = [ki * wp + kj for ki in range(3) for kj in range(3)]

    def kernel(xm_ref, xh_ref, mm_ref, mh_ref, sc_ref, sh_ref, w_ref, b_ref, o_ref):
        x = jnp.concatenate([xm_ref[...], xh_ref[...]], axis=0).astype(jnp.float32)
        m = jnp.concatenate([mm_ref[...], mh_ref[...]], axis=0)
        # BN scale/shift + ReLU, then zero the spatial-padding rows (conv pads AFTER relu)
        a = (jnp.maximum(x * sc_ref[...] + sh_ref[...], 0.0) * m).astype(jnp.bfloat16)
        w = w_ref[...]
        acc = jnp.zeros((tm, cout), jnp.float32)
        for t, off in enumerate(offsets):
            acc = acc + jnp.dot(a[off:off + tm, :], w[t * cin:(t + 1) * cin, :],
                                preferred_element_type=jnp.float32)
        o_ref[...] = (acc + b_ref[...]).astype(o_ref.dtype)

    return kernel


@functools.lru_cache(maxsize=None)
def _build_conv3_call(mp, tm, tb, wp, cin, cout, out_dtype):
    kstep = tm // tb
    in_specs = [
        pl.BlockSpec((tm, cin), lambda i: (i, 0)),                 # main rows
        pl.BlockSpec((tb, cin), lambda i: ((i + 1) * kstep, 0)),   # halo rows
        pl.BlockSpec((tm, 1), lambda i: (i, 0)),                   # pad mask (main)
        pl.BlockSpec((tb, 1), lambda i: ((i + 1) * kstep, 0)),     # pad mask (halo)
        pl.BlockSpec((1, cin), lambda i: (0, 0)),                  # BN scale
        pl.BlockSpec((1, cin), lambda i: (0, 0)),                  # BN shift
        pl.BlockSpec((9 * cin, cout), lambda i: (0, 0)),           # weights (resident)
        pl.BlockSpec((1, cout), lambda i: (0, 0)),                 # bias
    ]
    call = pl.pallas_call(
        _make_conv3_kernel(tm, wp, cin, cout),
        out_shape=jax.ShapeDtypeStruct((mp, cout), out_dtype),
        grid=(mp // tm,),
        in_specs=in_specs,
        out_specs=pl.BlockSpec((tm, cout), lambda i: (i, 0)),
        compiler_params=pltpu.CompilerParams(dimension_semantics=("parallel",)),
    )
    return jax.jit(call)


def conv3x3_s1_fused(x, scale, shift, wmat, b, out_dtype=jnp.bfloat16):
    n, h, w_, cin = x.shape
    cout = wmat.shape[1]
    hp, wp = h + 2, w_ + 2
    mv = n * hp * wp
    need = 2 * wp + 2                          # max flat tap offset + 1
    tm, mp = _choose_tm(mv, max(_MM_TM, need))
    if tm < need:                              # safety for extreme aspect ratios
        tm = _round_up(need, _ROW)
        mp = _round_up(mv, tm)
    tb = tm
    cand = _ROW
    while cand < tm:
        if tm % cand == 0 and cand >= need:
            tb = cand
            break
        cand += _ROW
    rows = mp + tb
    xp = jnp.pad(x, ((0, 0), (1, 1), (1, 1), (0, 0)))
    x_flat = _pad_rows(xp.reshape(mv, cin).astype(jnp.bfloat16), rows)
    mask = jnp.pad(jnp.ones((n, h, w_, 1), jnp.float32),
                   ((0, 0), (1, 1), (1, 1), (0, 0)))
    m_flat = _pad_rows(mask.reshape(mv, 1), rows)
    call = _build_conv3_call(mp, tm, tb, wp, cin, cout, out_dtype)
    out = call(x_flat, x_flat, m_flat, m_flat,
               scale.reshape(1, cin).astype(jnp.float32),
               shift.reshape(1, cin).astype(jnp.float32),
               wmat.astype(jnp.bfloat16),
               b.reshape(1, cout).astype(jnp.float32))
    return out[:mv].reshape(n, hp, wp, cout)[:, :h, :w_, :]


# ----------------------------------------------------------------------------
# Kernel 3: tiled per-channel sum / sum-of-squares (training-mode BN statistics).
# Resident (2, C) accumulator; grid axis must be sequential ("arbitrary").
# ----------------------------------------------------------------------------
def _bn_stats_kernel(x_ref, o_ref):
    @pl.when(pl.program_id(0) == 0)
    def _init():
        o_ref[...] = jnp.zeros_like(o_ref)

    x = x_ref[...].astype(jnp.float32)
    s = jnp.sum(x, axis=0, keepdims=True)
    sq = jnp.sum(x * x, axis=0, keepdims=True)
    o_ref[...] = o_ref[...] + jnp.concatenate([s, sq], axis=0)


@functools.lru_cache(maxsize=None)
def _build_stats_call(mp, c, tm):
    call = pl.pallas_call(
        _bn_stats_kernel,
        out_shape=jax.ShapeDtypeStruct((2, c), jnp.float32),
        grid=(mp // tm,),
        in_specs=[pl.BlockSpec((tm, c), lambda i: (i, 0))],
        out_specs=pl.BlockSpec((2, c), lambda i: (0, 0)),
        compiler_params=pltpu.CompilerParams(dimension_semantics=("arbitrary",)),
    )
    return jax.jit(call)


def bn_scale_shift(x_nhwc, gamma, beta):
    shp = x_nhwc.shape
    c = shp[-1]
    m = int(np.prod(shp[:-1]))
    tm, mp = _choose_tm(m, _EW_TM)
    xpad = _pad_rows(x_nhwc.reshape(m, c), mp)     # zero rows don't change the sums
    stats = _build_stats_call(mp, c, tm)(xpad)
    mean = stats[0] / m
    var = jnp.maximum(stats[1] / m - mean * mean, 0.0)
    scale = gamma * jax.lax.rsqrt(var + BN_EPS)
    shift = beta - mean * scale
    return scale, shift


# ----------------------------------------------------------------------------
# Kernel 4: standalone scale/shift + ReLU (used once, after the stem conv).
# ----------------------------------------------------------------------------
def _affine_relu_kernel(x_ref, sc_ref, sh_ref, o_ref):
    y = jnp.maximum(x_ref[...].astype(jnp.float32) * sc_ref[...] + sh_ref[...], 0.0)
    o_ref[...] = y.astype(o_ref.dtype)


@functools.lru_cache(maxsize=None)
def _build_affine_relu_call(mp, c, tm, out_dtype):
    call = pl.pallas_call(
        _affine_relu_kernel,
        out_shape=jax.ShapeDtypeStruct((mp, c), out_dtype),
        grid=(mp // tm,),
        in_specs=[pl.BlockSpec((tm, c), lambda i: (i, 0)),
                  pl.BlockSpec((1, c), lambda i: (0, 0)),
                  pl.BlockSpec((1, c), lambda i: (0, 0))],
        out_specs=pl.BlockSpec((tm, c), lambda i: (i, 0)),
        compiler_params=pltpu.CompilerParams(dimension_semantics=("parallel",)),
    )
    return jax.jit(call)


def affine_relu(x_nhwc, scale, shift):
    shp = x_nhwc.shape
    c = shp[-1]
    m = int(np.prod(shp[:-1]))
    tm, mp = _choose_tm(m, _EW_TM)
    xpad = _pad_rows(x_nhwc.reshape(m, c), mp)
    out = _build_affine_relu_call(mp, c, tm, jnp.bfloat16)(
        xpad, scale.reshape(1, c).astype(jnp.float32),
        shift.reshape(1, c).astype(jnp.float32))
    return out[:m].reshape(shp)


# ----------------------------------------------------------------------------
# Kernel 5: gridded n-ary elementwise combine (residual adds / 9-tap max pooling).
# ----------------------------------------------------------------------------
@functools.lru_cache(maxsize=None)
def _build_combine_call(mp, c, tm, n_in, opname, out_dtype):
    op = {"add": jnp.add, "max": jnp.maximum}[opname]

    def kernel(*refs):
        acc = refs[0][...]
        for r in refs[1:-1]:
            acc = op(acc, r[...])
        refs[-1][...] = acc

    call = pl.pallas_call(
        kernel,
        out_shape=jax.ShapeDtypeStruct((mp, c), out_dtype),
        grid=(mp // tm,),
        in_specs=[pl.BlockSpec((tm, c), lambda i: (i, 0)) for _ in range(n_in)],
        out_specs=pl.BlockSpec((tm, c), lambda i: (i, 0)),
        compiler_params=pltpu.CompilerParams(dimension_semantics=("parallel",)),
    )
    return jax.jit(call)


def _combine2d(arrays2d, opname, out_dtype):
    m, c = arrays2d[0].shape
    tm, mp = _choose_tm(m, _EW_TM)
    padded = [_pad_rows(a, mp) for a in arrays2d]
    out = _build_combine_call(mp, c, tm, len(padded), opname, out_dtype)(*padded)
    return out[:m]


def add_n(*arrays):
    shp = arrays[0].shape
    c = shp[-1]
    m = int(np.prod(shp[:-1]))
    out = _combine2d([a.reshape(m, c) for a in arrays], "add", jnp.bfloat16)
    return out.reshape(shp)


def max_pool_3x3_s2_p1(x):
    n, h, w, c = x.shape
    ho = (h + 2 - 3) // 2 + 1
    wo = (w + 2 - 3) // 2 + 1
    xp = jnp.pad(x, ((0, 0), (1, 1), (1, 1), (0, 0)), constant_values=_NEG_LARGE)
    taps = [xp[:, ki:ki + 2 * ho:2, kj:kj + 2 * wo:2, :].reshape(n * ho * wo, c)
            for ki in range(3) for kj in range(3)]
    out = _combine2d(taps, "max", jnp.bfloat16)
    return out.reshape(n, ho, wo, c)


# ----------------------------------------------------------------------------
# layer glue
# ----------------------------------------------------------------------------
def upsample2x(x):
    # F.interpolate(scale_factor=2), default mode='nearest'
    return jnp.repeat(jnp.repeat(x, 2, axis=1), 2, axis=2)


def plain_conv(x, p, skips=()):
    """Conv2d without BN in front.  1x1 -> fused matmul; other shapes -> im2col."""
    n, h, w, cin = x.shape
    k, s, pad = p["k"], p["stride"], p["pad"]
    cout = p["wmat"].shape[1]
    if k == 1 and s == 1 and pad == 0:
        out = fused_matmul(x.reshape(n * h * w, cin), p["wmat"], p["b"],
                           skips=[sk.reshape(n * h * w, cout) for sk in skips])
        return out.reshape(n, h, w, cout)
    # im2col fallback (only the 3x3 stride-2 stem conv uses this; K is tiny)
    ho = (h + 2 * pad - k) // s + 1
    wo = (w + 2 * pad - k) // s + 1
    xp = jnp.pad(x, ((0, 0), (pad, pad), (pad, pad), (0, 0)))
    cols = jnp.concatenate(
        [xp[:, ki:ki + s * ho:s, kj:kj + s * wo:s, :]
         for ki in range(k) for kj in range(k)], axis=-1
    ).reshape(n * ho * wo, k * k * cin)
    out = fused_matmul(cols, p["wmat"], p["b"],
                       skips=[sk.reshape(n * ho * wo, cout) for sk in skips])
    return out.reshape(n, ho, wo, cout)


def basic_block_fwd(x, p, extra_skips=()):
    """conv(relu(bn(x))) with optional fused additive skips on the conv output."""
    conv = p["conv"]
    scale, shift = bn_scale_shift(x, p["bn"]["gamma"], p["bn"]["beta"])
    k, s, pad = conv["k"], conv["stride"], conv["pad"]
    n, h, w, cin = x.shape
    cout = conv["wmat"].shape[1]
    if k == 3 and s == 1 and pad == 1 and not extra_skips:
        return conv3x3_s1_fused(x, scale, shift, conv["wmat"], conv["b"])
    if k == 1 and s == 1 and pad == 0:
        out = fused_matmul(x.reshape(n * h * w, cin), conv["wmat"], conv["b"],
                           scale=scale, shift=shift,
                           skips=[sk.reshape(n * h * w, cout) for sk in extra_skips])
        return out.reshape(n, h, w, cout)
    # generic fallback (not used by this architecture)
    return plain_conv(affine_relu(x, scale, shift), conv, skips=extra_skips)


def residual_mod_fwd(x, p, extra_skips=()):
    out = x
    for blk in p["blocks"][:-1]:
        out = basic_block_fwd(out, blk)
    skip = x if p["connect"] is None else plain_conv(x, p["connect"])
    last = p["blocks"][-1]
    lc = last["conv"]
    if lc["k"] == 1 and lc["stride"] == 1 and lc["pad"] == 0:
        # fuse the residual skip (and any extra addends) into the final 1x1 conv epilogue
        return basic_block_fwd(out, last, extra_skips=(skip,) + tuple(extra_skips))
    out = basic_block_fwd(out, last)
    return add_n(out, skip, *extra_skips)


def hourglass_fwd(x, p):
    order = p["order"]

    def helper(x, count):
        out = max_pool_3x3_s2_p1(x)
        out = residual_mod_fwd(out, p["mods"][3 * count])
        out_branch = residual_mod_fwd(out, p["mods"][3 * count + 2])
        if count < order - 1:
            out = add_n(helper(out, count + 1), out_branch)
        else:
            # deepest level: fold "+ out_branch" into the residual mod's final conv
            out = residual_mod_fwd(out, p["mods"][3 * count + 3],
                                   extra_skips=(out_branch,))
        out = upsample2x(residual_mod_fwd(out, p["mods"][3 * count + 1]))
        return add_n(out, x)

    return helper(x, 0)


# ----------------------------------------------------------------------------
# parameter init
# ----------------------------------------------------------------------------
class KeyGen:
    def __init__(self, key):
        self.key = key

    def next(self):
        self.key, sub = jax.random.split(self.key)
        return sub


def init_conv(kg, cin, cout, k=1, stride=1, pad=0):
    fan_in = cin * k * k
    w = jax.random.normal(kg.next(), (k, k, cin, cout), jnp.float32) / np.sqrt(fan_in)
    b = 0.01 * jax.random.normal(kg.next(), (cout,), jnp.float32)
    return {"wmat": w.reshape(k * k * cin, cout).astype(jnp.bfloat16),
            "b": b, "k": k, "stride": stride, "pad": pad}


def init_bn(kg, c):
    gamma = 1.0 + 0.01 * jax.random.normal(kg.next(), (c,), jnp.float32)
    beta = 0.01 * jax.random.normal(kg.next(), (c,), jnp.float32)
    return {"gamma": gamma, "beta": beta}


def init_basic_block(kg, cin, cout, size=1, stride=1, pad=0):
    return {"bn": init_bn(kg, cin), "conv": init_conv(kg, cin, cout, size, stride, pad)}


def init_residual_mod(kg, layers, in_ch, out_ch, stride):
    size = [1, 3, 1]
    pad = [0, 1, 0]
    blocks = [init_basic_block(kg, in_ch[j], out_ch[j], size[j], stride[j], pad[j])
              for j in range(layers)]
    connect = None
    if out_ch[-2] != out_ch[-1]:
        connect = init_conv(kg, out_ch[-2], out_ch[-1], 1, 1, 0)
    return {"blocks": blocks, "connect": connect}


def init_hourglass(kg, order, c):
    mods = []
    for _ in range(order):
        for _ in range(3):
            mods.append(init_residual_mod(kg, 3, [c] * 3, [c] * 3, [1, 1, 1]))
    mods.append(init_residual_mod(kg, 3, [c] * 3, [c] * 3, [1, 1, 1]))
    return {"mods": mods, "order": order}


def init_network(kg, num_hg, num_classes, in_channel, input_dim, order, input_size):
    start = {
        "conv1": init_conv(kg, in_channel, 64, 3, 2, 1),
        "bn1": init_bn(kg, 64),
        "res1": init_residual_mod(kg, 3, [64, 64, 64], [64, 64, 128], [1, 1, 1]),
        "res2": init_residual_mod(kg, 3, [128, 128, 128], [128, 128, 128], [1, 1, 1]),
        "res3": init_residual_mod(kg, 3, [128, 128, 128], [128, 128, input_dim], [1, 1, 1]),
    }
    channels = [input_dim] * (num_hg + 1)
    hg_net = []
    for j in range(num_hg - 1):
        hg_net.append(init_hourglass(kg, order, channels[j]))
        hg_net.append(init_residual_mod(kg, 1, [channels[j]] * 3, [channels[j]] * 3, [1, 1, 1]))
        hg_net.append(init_conv(kg, channels[j], 1, 1))
        hg_net.append(init_conv(kg, 1, channels[j + 1], 1))
        hg_net.append(init_conv(kg, channels[j], channels[j + 1], 1))
    hg_net.append(init_hourglass(kg, order, channels[num_hg - 1]))
    hg_net.append(init_conv(kg, channels[num_hg - 1], 1, 1))

    feat = input_size // (4 * 4)
    fc = []
    for _ in range(num_hg):
        wmat = (jax.random.normal(kg.next(), (feat, 2 * num_classes), jnp.float32)
                / np.sqrt(feat)).astype(jnp.bfloat16)
        b = 0.01 * jax.random.normal(kg.next(), (2 * num_classes,), jnp.float32)
        fc.append({"wmat": wmat, "b": b})
    return {"start": start, "hg_net": hg_net, "fc": fc, "num_hg": num_hg}


# ----------------------------------------------------------------------------
# network forward
# ----------------------------------------------------------------------------
def start_fwd(x, p):
    x = plain_conv(x, p["conv1"])                     # 3x3 stride-2 stem (im2col path)
    sc, sh = bn_scale_shift(x, p["bn1"]["gamma"], p["bn1"]["beta"])
    x = affine_relu(x, sc, sh)
    x = residual_mod_fwd(x, p["res1"])
    x = max_pool_3x3_s2_p1(x)
    x = residual_mod_fwd(x, p["res2"])
    x = residual_mod_fwd(x, p["res3"])
    return x


def hourglass_network_fwd(img_nchw, params):
    # NCHW (PyTorch) -> NHWC bf16 kernel layout
    x = jnp.transpose(img_nchw, (0, 2, 3, 1)).astype(jnp.bfloat16)
    x = start_fwd(x, params["start"])
    hg_net, fc, num_hg = params["hg_net"], params["fc"], params["num_hg"]
    result = {}
    j = 0
    for j in range(num_hg - 1):
        out_hg = hourglass_fwd(x, hg_net[j * 5])
        ll = residual_mod_fwd(out_hg, hg_net[j * 5 + 1])
        hmap = plain_conv(ll, hg_net[j * 5 + 2])          # C -> 1 heat-map head
        branch = plain_conv(hmap, hg_net[j * 5 + 3])      # 1 -> C
        # x_{j+1} = conv(ll) + branch + x, fused as matmul epilogue adds
        x = plain_conv(ll, hg_net[j * 5 + 4], skips=(branch, x))
        flat = hmap.reshape(hmap.shape[0], -1)            # C == 1 so NHWC flatten == NCHW
        result["heat_map_" + str(j)] = jax.nn.sigmoid(
            fused_matmul(flat, fc[j]["wmat"], fc[j]["b"], out_dtype=jnp.float32))
    out = plain_conv(hourglass_fwd(x, hg_net[-2]), hg_net[-1])
    flat = out.reshape(out.shape[0], -1)
    # NOTE: matches the PyTorch reference, which reuses fc[j] (j == num_hg - 2) here.
    result["result"] = jax.nn.sigmoid(
        fused_matmul(flat, fc[j]["wmat"], fc[j]["b"], out_dtype=jnp.float32))
    return result


# ----------------------------------------------------------------------------
if __name__ == "__main__":
    # batch=2, in_channel=4, 32x32 input -> after `start` spatial is 8x8,
    # hourglass width (input_dim)=32, num_hg=2, order=2, num_classes=3.
    B, CIN, H, W = 2, 4, 32, 32
    NUM_HG, NUM_CLASSES, INPUT_DIM, ORDER = 2, 3, 32, 2
    INPUT_SIZE = H * W

    root = jax.random.PRNGKey(0)
    k_params, k_img = jax.random.split(root)
    params = init_network(KeyGen(k_params), NUM_HG, NUM_CLASSES, CIN, INPUT_DIM,
                          ORDER, INPUT_SIZE)
    img = jax.random.normal(k_img, (B, CIN, H, W), jnp.float32)

    result = hourglass_network_fwd(img, params)
    result = jax.block_until_ready(result)

    assert result["result"].shape == (B, 2 * NUM_CLASSES)
    assert result["heat_map_0"].shape == (B, 2 * NUM_CLASSES)
    assert all(bool(jnp.all(jnp.isfinite(v))) for v in result.values())
    print("KERNEL_OK")
</pallas_src>

<mosaic_0001>
module attributes {stable_mosaic.version = 11 : i64} {
  func.func @kernel(%arg0: i32, %arg1: memref<256x48xbf16, #tpu.memory_space<vmem>>, %arg2: memref<48x64xbf16, #tpu.memory_space<vmem>>, %arg3: memref<1x64xf32, #tpu.memory_space<vmem>>, %arg4: memref<256x64xbf16, #tpu.memory_space<vmem>>) attributes {dimension_semantics = [#tpu.dimension_semantics<parallel>], iteration_bounds = array<i64: 2>, scalar_prefetch = 0 : i64, scratch_operands = 0 : i64, tpu.core_type = #tpu.core_type<tc>, window_params = [{transform_indices = @transform_0, window_bounds = array<i64: 256, 48>}, {pipeline_mode = #tpu.pipeline_mode<synchronous>, transform_indices = @transform_1, window_bounds = array<i64: 48, 64>}, {pipeline_mode = #tpu.pipeline_mode<synchronous>, transform_indices = @transform_2, window_bounds = array<i64: 1, 64>}, {transform_indices = @transform_3, window_bounds = array<i64: 256, 64>}]} {
    %c0 = arith.constant 0 : index
    %c0_0 = arith.constant 0 : index
    %0 = vector.load %arg1[%c0, %c0_0] : memref<256x48xbf16, #tpu.memory_space<vmem>>, vector<256x48xbf16>
    %c0_1 = arith.constant 0 : index
    %c0_2 = arith.constant 0 : index
    %1 = vector.load %arg2[%c0_1, %c0_2] : memref<48x64xbf16, #tpu.memory_space<vmem>>, vector<48x64xbf16>
    %cst = arith.constant dense<0.000000e+00> : vector<256x64xf32>
    %2 = tpu.matmul %0, %1, %cst {dimension_numbers = #tpu.dot_dimension_numbers<[1], [0], [0], [1], [0, 0, 1, 1], [], []>} : vector<256x48xbf16>, vector<48x64xbf16>, vector<256x64xf32> -> vector<256x64xf32>
    %c0_3 = arith.constant 0 : index
    %c0_4 = arith.constant 0 : index
    %3 = vector.load %arg3[%c0_3, %c0_4] : memref<1x64xf32, #tpu.memory_space<vmem>>, vector<1x64xf32>
    %4 = vector.broadcast %3 : vector<1x64xf32> to vector<256x64xf32>
    %5 = arith.addf %2, %4 : vector<256x64xf32>
    %6 = arith.truncf %5 : vector<256x64xf32> to vector<256x64xbf16>
    %c0_5 = arith.constant 0 : index
    %c0_6 = arith.constant 0 : index
    %7 = vector.load %arg4[%c0_5, %c0_6] : memref<256x64xbf16, #tpu.memory_space<vmem>>, vector<256x64xbf16>
    tpu.vector_store %arg4[%c0_5, %c0_6], %6 {strides = array<i32>} : memref<256x64xbf16, #tpu.memory_space<vmem>>, vector<256x64xbf16>,
    return
  }
  func.func @transform_0(%arg0: i32) -> (i32, i32) {
    %c0_i32 = arith.constant 0 : i32
    %c0_i32_0 = arith.constant 0 : i32
    return %arg0, %c0_i32 : i32, i32
  }
  func.func @transform_1(%arg0: i32) -> (i32, i32) {
    %c0_i32 = arith.constant 0 : i32
    %c0_i32_0 = arith.constant 0 : i32
    %c0_i32_1 = arith.constant 0 : i32
    return %c0_i32, %c0_i32_0 : i32, i32
  }
  func.func @transform_2(%arg0: i32) -> (i32, i32) {
    %c0_i32 = arith.constant 0 : i32
    %c0_i32_0 = arith.constant 0 : i32
    %c0_i32_1 = arith.constant 0 : i32
    return %c0_i32, %c0_i32_0 : i32, i32
  }
  func.func @transform_3(%arg0: i32) -> (i32, i32) {
    %c0_i32 = arith.constant 0 : i32
    %c0_i32_0 = arith.constant 0 : i32
    return %arg0, %c0_i32 : i32, i32
  }
}

</mosaic_0001>

<bundles_post_ra>
// kernel: tpu_custom_call.1
= control target key start
LH: loop header
LB: loop body
LE: loop exit
PB: predicated region body
PF: predicated region fallthrough
CT: control target
= control target key end

     0   :  { %s974_s12 = smov 0   ;;  %s1144_s0 = inlined_call_operand.vmem [shape: bf16[512,48], index: 0, kind: input, shape index: {}]   ;;  %s1145_s1 = inlined_call_operand.vmem [shape: bf16[48,64], index: 1, kind: input, shape index: {}]   ;;  %s1146_s2 = inlined_call_operand.vmem [shape: f32[1,64], index: 2, kind: input, shape index: {}]   ;;  %s1147_s3 = inlined_call_operand.vmem [shape: bf16[512,64], index: 3, kind: output, shape index: {}]  }
   0x1 LB: > { %s745_s13 = sadd.s32 4294967295, %s952_s12   ;;  %p749_p0 = scmp.ge.s32.totalorder %s952_s12, 1  ;;  %s952_s12 = sphi %s974_s12, %s13_s12  }
   0x2   : > { %p138_p1 = scmp.lt.s32.totalorder %s952_s12, 3 }
   0x4   : > { %p139_p2 = pnand %p749_p0, %p138_p1 }
   0x5   : > { %v927_v0 = vld [vmem:[%s1145_s1] sm:$0xff] (!%p139_p2)   ;;  %s750_s16 = sshll.u32 (!%p139_p2), %s745_s13, 5  ;;  %v928_v1 = vld [vmem:[%s1145_s1 + $0x8] sm:$0xff] (!%p139_p2)   ;;  %v929_v2 = vld [vmem:[%s1145_s1 + $0x10] sm:$0xff] (!%p139_p2)   ;;  %vm318_vm0 = vcmask (!%p139_p2), 392192   ;;  %vm656_vm1 = vcmask (!%p139_p2), 519168  }
   0x6   : > { %142 = sbr.rel (%p139_p2) target bundleno = 263 (0x107), region = 32  ;;  %p163_p3 = scmp.lt.s32.totalorder (!%p139_p2), %s750_s16, 63  ;;  %875 = vmatprep.subr.bf16.mxu0 (!%p139_p2), %v927_v0  ;;  %913 = vmatprep.subr.bf16.mxu1 (!%p139_p2), %v927_v0  ;;  %v1036_v19 = vld [vmem:[%s1146_s2] ss:$0 sm:$0xff] (!%p139_p2) }
   0x7   : > { %876 = vmatpush3.bf16.msra.mxu0 (!%p139_p2), %v927_v0  ;;  %916 = vmatpush3.bf16.msra.mxu1 (!%p139_p2), %v927_v0 }
   0x8   : > { %877 = vmatprep.subr.bf16.mxu0 (!%p139_p2), %v928_v1  ;;  %914 = vmatprep.subr.bf16.mxu1 (!%p139_p2), %v928_v1 }
   0xb   : > { %878 = vmatpush3.bf16.msra.mxu0 (!%p139_p2), %v928_v1  ;;  %917 = vmatpush3.bf16.msra.mxu1 (!%p139_p2), %v928_v1 }
   0xc   : > { %879 = vmatprep.subr.bf16.mxu0 (!%p139_p2), %v929_v2  ;;  %915 = vmatprep.subr.bf16.mxu1 (!%p139_p2), %v929_v2 }
   0xd   : > { %s1149_s16 = smov (!%p163_p3, %s750_s16), 63 }
   0xe   : > { %s751_s21 = sshll.u32 %s1149_s16, 2 }
   0xf   : > { %s999_s24 = scalar_lea.vmem %s1144_s0, %s751_s21  ;;  %880 = vmatpush3.bf16.msra.mxu0 %v929_v2  ;;  %918 = vmatpush3.bf16.msra.mxu1 %v929_v2  ;;  %s1045_s29 = scalar_lea.vmem %s1147_s3, %s751_s21 }
  0x10   : > { %v930_v3 = vld [vmem:[%s999_s24] sm:$0xff]   ;;  %v932_v5 = vld [vmem:[%s999_s24 + $0x8] sm:$0xff]   ;;  %v934_v7 = vld [vmem:[%s999_s24 + $0x10] sm:$0xff]  }
  0x11   : > { %v931_v4 = vld [vmem:[%s999_s24 + $0x40] sm:$0xff]   ;;  %881 = vmatprep.mubr.msk.bf16.mxu0 %vm318_vm0, %v930_v3  ;;  %v933_v6 = vld [vmem:[%s999_s24 + $0x48] sm:$0xff]   ;;  %v935_v8 = vld [vmem:[%s999_s24 + $0x50] sm:$0xff]  }
  0x12   : > { %897 = vmatprep.mubr.msk.bf16.mxu1 %vm318_vm0, %v931_v4  ;;  %882 = vmatmul.mubr.msk.bf16.vlgmr.msra.gmra.mrb[0].mxu0 %vm318_vm0, %v932_v5  ;;  %v936_v9 = vld [vmem:[%s999_s24 + $0x18] sm:$0xff]   ;;  %v938_v11 = vld [vmem:[%s999_s24 + $0x20] sm:$0xff]   ;;  %v940_v13 = vld [vmem:[%s999_s24 + $0x28] sm:$0xff]  }
  0x13   : > { %898 = vmatmul.mubr.msk.bf16.vlgmr.msra.gmra.mrb[0].mxu1 %vm318_vm0, %v933_v6  ;;  %885 = vmatprep.mubr.msk.bf16.mxu0 %vm318_vm0, %v934_v7  ;;  %v937_v10 = vld [vmem:[%s999_s24 + $0x58] sm:$0xff]   ;;  %v939_v12 = vld [vmem:[%s999_s24 + $0x60] sm:$0xff]   ;;  %v941_v14 = vld [vmem:[%s999_s24 + $0x68] sm:$0xff]  }
  0x14   : > { %901 = vmatprep.mubr.msk.bf16.mxu1 %vm318_vm0, %v935_v8  ;;  %v942_v15 = vld [vmem:[%s999_s24 + $0x30] sm:$0xff]   ;;  %v944_v17 = vld [vmem:[%s999_s24 + $0x38] sm:$0xff]  }
  0x15   : > { %v943_v16 = vld [vmem:[%s999_s24 + $0x70] sm:$0xff]   ;;  %v945_v18 = vld [vmem:[%s999_s24 + $0x78] sm:$0xff]  }
  0x1a   : > { %886 = vmatmul.mubr.msk.bf16.gmra.mrb[4].mxu0 %vm318_vm0, %v936_v9 }
  0x1b   : > { %902 = vmatmul.mubr.msk.bf16.gmra.mrb[4].mxu1 %vm318_vm0, %v937_v10  ;;  %889 = vmatprep.mubr.msk.bf16.mxu0 %vm318_vm0, %v938_v11 }
  0x1c   : > { %905 = vmatprep.mubr.msk.bf16.mxu1 %vm318_vm0, %v939_v12 }
  0x22   : > { %890 = vmatmul.mubr.msk.bf16.gmra.mrb[8].mxu0 %vm318_vm0, %v940_v13 }
  0x23   : > { %906 = vmatmul.mubr.msk.bf16.gmra.mrb[8].mxu1 %vm318_vm0, %v941_v14  ;;  %893 = vmatprep.mubr.msk.bf16.mxu0 %vm318_vm0, %v942_v15 }
  0x24   : > { %909 = vmatprep.mubr.msk.bf16.mxu1 %vm318_vm0, %v943_v16 }
  0x2a   : > { %894 = vmatmul.mubr.msk.bf16.gmra.mrb[12].mxu0 %vm318_vm0, %v944_v17 }
  0x2b   : > { %910 = vmatmul.mubr.msk.bf16.gmra.mrb[12].mxu1 %vm318_vm0, %v945_v18 }
  0xe5   : > { %v883_v20 = vpop.f32.mrb[0].mxu0 }
  0xe6   : > { %v899_v21 = vpop.f32.mrb[0].mxu1  ;;  %v410_v22 = vadd.f32 %v883_v20, %v1036_v19  ;;  %v401_v24 = vpop.f32.mrb[1].mxu0 }
  0xe7   : > { %v474_v23 = vadd.f32 %v899_v21, %v1036_v19  ;;  %v465_v25 = vpop.f32.mrb[1].mxu1  ;;  %v402_v26 = vadd.f32 %v1036_v19, %v401_v24  ;;  %v884_v28 = vpop.f32.mrb[2].mxu0 }
  0xe8   : > { %v466_v27 = vadd.f32 %v1036_v19, %v465_v25  ;;  %v900_v29 = vpop.f32.mrb[2].mxu1  ;;  %v826_v30 = vpack.c.bf16 %v410_v22, %v410_v22  ;;  %v413_v32 = vadd.f32 %v884_v28, %v1036_v19  ;;  %v404_v34 = vpop.f32.mrb[3].mxu0 }
  0xe9   : > { %v842_v31 = vpack.c.bf16 %v474_v23, %v474_v23  ;;  %v477_v33 = vadd.f32 %v900_v29, %v1036_v19  ;;  %v468_v35 = vpop.f32.mrb[3].mxu1  ;;  %v824_v36 = vpack.c.bf16 %v402_v26, %v402_v26  ;;  %v405_v38 = vadd.f32 %v1036_v19, %v404_v34 }
  0xea   : > { %v840_v37 = vpack.c.bf16 %v466_v27, %v466_v27  ;;  %v469_v39 = vadd.f32 %v1036_v19, %v468_v35  ;;  %659 = vst.msk [vmem:[%s1045_s29 + $0x8] sm:$0xf] %vm656_vm1, %v826_v30  ;;  %v827_v40 = vpack.c.bf16 %v413_v32, %v413_v32 }
  0xeb   : > { %675 = vst.msk [vmem:[%s1045_s29 + $0x48] sm:$0xf] %vm656_vm1, %v842_v31  ;;  %v843_v41 = vpack.c.bf16 %v477_v33, %v477_v33  ;;  %657 = vst.msk [vmem:[%s1045_s29] sm:$0xf] %vm656_vm1, %v824_v36  ;;  %v825_v42 = vpack.c.bf16 %v405_v38, %v405_v38 }
  0xec   : > { %673 = vst.msk [vmem:[%s1045_s29 + $0x40] sm:$0xf] %vm656_vm1, %v840_v37  ;;  %v841_v43 = vpack.c.bf16 %v469_v39, %v469_v39  ;;  %660 = vst.msk [vmem:[%s1045_s29 + $0xc] sm:$0xf] %vm656_vm1, %v827_v40 }
  0xed   : > { %676 = vst.msk [vmem:[%s1045_s29 + $0x4c] sm:$0xf] %vm656_vm1, %v843_v41  ;;  %658 = vst.msk [vmem:[%s1045_s29 + $0x4] sm:$0xf] %vm656_vm1, %v825_v42  ;;  %v887_v44 = vpop.f32.mrb[4].mxu0 }
  0xee   : > { %674 = vst.msk [vmem:[%s1045_s29 + $0x44] sm:$0xf] %vm656_vm1, %v841_v43  ;;  %v903_v45 = vpop.f32.mrb[4].mxu1  ;;  %v426_v46 = vadd.f32 %v887_v44, %v1036_v19  ;;  %v417_v48 = vpop.f32.mrb[5].mxu0 }
  0xef   : > { %v490_v47 = vadd.f32 %v903_v45, %v1036_v19  ;;  %v481_v49 = vpop.f32.mrb[5].mxu1  ;;  %v418_v50 = vadd.f32 %v1036_v19, %v417_v48  ;;  %v888_v52 = vpop.f32.mrb[6].mxu0 }
  0xf0   : > { %v482_v51 = vadd.f32 %v1036_v19, %v481_v49  ;;  %v904_v53 = vpop.f32.mrb[6].mxu1  ;;  %v830_v54 = vpack.c.bf16 %v426_v46, %v426_v46  ;;  %v429_v56 = vadd.f32 %v888_v52, %v1036_v19  ;;  %v420_v58 = vpop.f32.mrb[7].mxu0 }
  0xf1   : > { %v846_v55 = vpack.c.bf16 %v490_v47, %v490_v47  ;;  %v493_v57 = vadd.f32 %v904_v53, %v1036_v19  ;;  %v484_v59 = vpop.f32.mrb[7].mxu1  ;;  %v828_v60 = vpack.c.bf16 %v418_v50, %v418_v50  ;;  %v421_v62 = vadd.f32 %v1036_v19, %v420_v58 }
  0xf2   : > { %v844_v61 = vpack.c.bf16 %v482_v51, %v482_v51  ;;  %v485_v63 = vadd.f32 %v1036_v19, %v484_v59  ;;  %663 = vst.msk [vmem:[%s1045_s29 + $0x18] sm:$0xf] %vm656_vm1, %v830_v54  ;;  %v831_v0 = vpack.c.bf16 %v429_v56, %v429_v56 }
  0xf3   : > { %679 = vst.msk [vmem:[%s1045_s29 + $0x58] sm:$0xf] %vm656_vm1, %v846_v55  ;;  %v847_v1 = vpack.c.bf16 %v493_v57, %v493_v57  ;;  %661 = vst.msk [vmem:[%s1045_s29 + $0x10] sm:$0xf] %vm656_vm1, %v828_v60  ;;  %v829_v2 = vpack.c.bf16 %v421_v62, %v421_v62 }
  0xf4   : > { %677 = vst.msk [vmem:[%s1045_s29 + $0x50] sm:$0xf] %vm656_vm1, %v844_v61  ;;  %v845_v3 = vpack.c.bf16 %v485_v63, %v485_v63  ;;  %664 = vst.msk [vmem:[%s1045_s29 + $0x1c] sm:$0xf] %vm656_vm1, %v831_v0 }
  0xf5   : > { %680 = vst.msk [vmem:[%s1045_s29 + $0x5c] sm:$0xf] %vm656_vm1, %v847_v1  ;;  %662 = vst.msk [vmem:[%s1045_s29 + $0x14] sm:$0xf] %vm656_vm1, %v829_v2  ;;  %v891_v4 = vpop.f32.mrb[8].mxu0 }
  0xf6   : > { %678 = vst.msk [vmem:[%s1045_s29 + $0x54] sm:$0xf] %vm656_vm1, %v845_v3  ;;  %v907_v5 = vpop.f32.mrb[8].mxu1  ;;  %v442_v6 = vadd.f32 %v891_v4, %v1036_v19  ;;  %v433_v8 = vpop.f32.mrb[9].mxu0 }
  0xf7   : > { %v506_v7 = vadd.f32 %v907_v5, %v1036_v19  ;;  %v497_v9 = vpop.f32.mrb[9].mxu1  ;;  %v434_v10 = vadd.f32 %v1036_v19, %v433_v8  ;;  %v892_v12 = vpop.f32.mrb[10].mxu0 }
  0xf8   : > { %v498_v11 = vadd.f32 %v1036_v19, %v497_v9  ;;  %v908_v13 = vpop.f32.mrb[10].mxu1  ;;  %v834_v14 = vpack.c.bf16 %v442_v6, %v442_v6  ;;  %v445_v16 = vadd.f32 %v892_v12, %v1036_v19  ;;  %v436_v18 = vpop.f32.mrb[11].mxu0 }
  0xf9   : > { %v850_v15 = vpack.c.bf16 %v506_v7, %v506_v7  ;;  %v509_v17 = vadd.f32 %v908_v13, %v1036_v19  ;;  %v500_v20 = vpop.f32.mrb[11].mxu1  ;;  %v832_v21 = vpack.c.bf16 %v434_v10, %v434_v10  ;;  %v437_v23 = vadd.f32 %v1036_v19, %v436_v18 }
  0xfa   : > { %v848_v22 = vpack.c.bf16 %v498_v11, %v498_v11  ;;  %v501_v24 = vadd.f32 %v1036_v19, %v500_v20  ;;  %667 = vst.msk [vmem:[%s1045_s29 + $0x28] sm:$0xf] %vm656_vm1, %v834_v14  ;;  %v835_v25 = vpack.c.bf16 %v445_v16, %v445_v16 }
  0xfb   : > { %683 = vst.msk [vmem:[%s1045_s29 + $0x68] sm:$0xf] %vm656_vm1, %v850_v15  ;;  %v851_v26 = vpack.c.bf16 %v509_v17, %v509_v17  ;;  %665 = vst.msk [vmem:[%s1045_s29 + $0x20] sm:$0xf] %vm656_vm1, %v832_v21  ;;  %v833_v27 = vpack.c.bf16 %v437_v23, %v437_v23 }
  0xfc   : > { %681 = vst.msk [vmem:[%s1045_s29 + $0x60] sm:$0xf] %vm656_vm1, %v848_v22  ;;  %v849_v28 = vpack.c.bf16 %v501_v24, %v501_v24  ;;  %668 = vst.msk [vmem:[%s1045_s29 + $0x2c] sm:$0xf] %vm656_vm1, %v835_v25 }
  0xfd   : > { %684 = vst.msk [vmem:[%s1045_s29 + $0x6c] sm:$0xf] %vm656_vm1, %v851_v26  ;;  %666 = vst.msk [vmem:[%s1045_s29 + $0x24] sm:$0xf] %vm656_vm1, %v833_v27  ;;  %v895_v29 = vpop.f32.mrb[12].mxu0 }
  0xfe   : > { %682 = vst.msk [vmem:[%s1045_s29 + $0x64] sm:$0xf] %vm656_vm1, %v849_v28  ;;  %v911_v30 = vpop.f32.mrb[12].mxu1  ;;  %v458_v31 = vadd.f32 %v895_v29, %v1036_v19  ;;  %v449_v33 = vpop.f32.mrb[13].mxu0 }
  0xff   : > { %v522_v32 = vadd.f32 %v911_v30, %v1036_v19  ;;  %v513_v34 = vpop.f32.mrb[13].mxu1  ;;  %v450_v35 = vadd.f32 %v1036_v19, %v449_v33  ;;  %v896_v37 = vpop.f32.mrb[14].mxu0 }
 0x100   : > { %v514_v36 = vadd.f32 %v1036_v19, %v513_v34  ;;  %v912_v38 = vpop.f32.mrb[14].mxu1  ;;  %v838_v39 = vpack.c.bf16 %v458_v31, %v458_v31  ;;  %v461_v41 = vadd.f32 %v896_v37, %v1036_v19  ;;  %v452_v43 = vpop.f32.mrb[15].mxu0 }
 0x101   : > { %v854_v40 = vpack.c.bf16 %v522_v32, %v522_v32  ;;  %v525_v42 = vadd.f32 %v912_v38, %v1036_v19  ;;  %v516_v44 = vpop.f32.mrb[15].mxu1  ;;  %v836_v45 = vpack.c.bf16 %v450_v35, %v450_v35  ;;  %v453_v47 = vadd.f32 %v1036_v19, %v452_v43 }
 0x102   : > { %v852_v46 = vpack.c.bf16 %v514_v36, %v514_v36  ;;  %v517_v48 = vadd.f32 %v1036_v19, %v516_v44  ;;  %671 = vst.msk [vmem:[%s1045_s29 + $0x38] sm:$0xf] %vm656_vm1, %v838_v39  ;;  %v839_v49 = vpack.c.bf16 %v461_v41, %v461_v41 }
 0x103   : > { %687 = vst.msk [vmem:[%s1045_s29 + $0x78] sm:$0xf] %vm656_vm1, %v854_v40  ;;  %v855_v50 = vpack.c.bf16 %v525_v42, %v525_v42  ;;  %669 = vst.msk [vmem:[%s1045_s29 + $0x30] sm:$0xf] %vm656_vm1, %v836_v45  ;;  %v837_v51 = vpack.c.bf16 %v453_v47, %v453_v47 }
 0x104   : > { %685 = vst.msk [vmem:[%s1045_s29 + $0x70] sm:$0xf] %vm656_vm1, %v852_v46  ;;  %v853_v52 = vpack.c.bf16 %v517_v48, %v517_v48  ;;  %672 = vst.msk [vmem:[%s1045_s29 + $0x3c] sm:$0xf] %vm656_vm1, %v839_v49 }
 0x105   : > { %688 = vst.msk [vmem:[%s1045_s29 + $0x7c] sm:$0xf] %vm656_vm1, %v855_v50  ;;  %670 = vst.msk [vmem:[%s1045_s29 + $0x34] sm:$0xf] %vm656_vm1, %v837_v51 }
 0x106   : > { %686 = vst.msk [vmem:[%s1045_s29 + $0x74] sm:$0xf] %vm656_vm1, %v853_v52 }
 0x107 PF: > { %s13_s12 = sadd.s32 1, %s952_s12  }
 0x108   : > { %p10_p4 = scmp.ge.s32.totalorder %s13_s12, 4  }
 0x10a   :  { %12 = sbr.rel (!%p10_p4) target bundleno = 1 (0x1), region = 62 }

</bundles_post_ra>
